<compile_context>
chip_gen: v7x
topology: tpu7x:2x2x1
jax: 0.10.0
libtpu: 0.0.40
codegen_flags: <defaults>
</compile_context>

<pallas_src>
import numpy as np
import jax
import jax.numpy as jnp
from jax.experimental import pallas as pl
from jax.experimental.pallas import tpu as pltpu


def _affine_flow_kernel(z_ref, es_ref, t_ref, out_ref):
    # Pure streaming FMA: out = z * exp(s) + t   (exp hoisted to the wrapper).
    # es_ref / t_ref either match z_ref's block shape exactly (small-batch fold
    # path) or have a single sublane row and broadcast over the batch rows.
    out_ref[...] = (z_ref[...] * es_ref[...] + t_ref[...]).astype(out_ref.dtype)


def _round_down(x, m):
    return max(m, (x // m) * m)


def affine_flow_forward(z, s, t):
    """z: (B, *shape); s, t: (1, *shape)  ->  (z_out, log_det)."""
    B = int(z.shape[0])
    feat_shape = z.shape[1:]
    N = int(np.prod(feat_shape))
    itemsize = jnp.dtype(z.dtype).itemsize

    # ---------- layout: flatten to (rows, cols) ----------------------------
    # Batch on sublanes, features on lanes.  For tiny batches fold feature
    # chunks into extra rows so every (8,128) vreg carries real data; only
    # accept folds that keep the row count a multiple of 8 (legal, unmasked
    # blocks under the (8,128) block-shape rule).
    fold = 1
    if B < 8:
        for cand in (8, 4, 2):
            if N % (cand * 128) == 0 and (B * cand) % 8 == 0:
                fold = cand
                break
    rows_valid = B * fold
    cols = N // fold

    z2 = z.reshape(rows_valid, cols)
    rows = rows_valid
    if fold == 1 and rows < 8:
        # Degenerate tiny-batch case with no usable fold: pad to 8 sublanes so
        # blocks/stores are dense; padded rows are sliced off below.
        z2 = jnp.pad(z2, ((0, 8 - rows), (0, 0)))
        rows = 8

    # ---------- per-generation VMEM budget ----------------------------------
    vmem_cap = 64 * 2**20                      # conservative default (v7x per-TC)
    try:
        info = pltpu.get_tpu_info()
        cap = getattr(info, "vmem_capacity_bytes", None)
        if cap:
            vmem_cap = int(cap)
    except Exception:
        pass
    # Generous scoped limit with headroom below physical capacity
    # (-> ~100 MiB on v5e/v6e, ~56 MiB on v7x).
    vmem_limit = max(32 * 2**20, min(vmem_cap - 8 * 2**20, 100 * 2**20))

    # Tile-shaped buffers in flight: z + out (double-buffered) = 4, plus the
    # row-tiled parameters (another 4) on the fold path.
    pipeline_arrays = 4 if fold == 1 else 8
    per_tile_budget = min(vmem_limit // (2 * pipeline_arrays), 8 * 2**20)
    max_tile_elems = max(8 * 128, per_tile_budget // itemsize)

    # ---------- tile selection (respects the (8,128) rule) ------------------
    tile_c_cap = _round_down(max_tile_elems // 8, 128)
    if cols <= tile_c_cap:
        tile_c = cols                          # full extent (legal even if %128 != 0)
    else:
        tile_c = min(tile_c_cap, _round_down(cols, 128))

    tile_r_cap = max(8, max_tile_elems // tile_c)
    if rows <= tile_r_cap:
        tile_r = rows                          # full extent
    else:
        tile_r = _round_down(tile_r_cap, 8)

    # Ensure >=2 grid steps along a parallel axis so v7x can shard across its
    # two TensorCores (one extra ~0.35us step on 1-TC chips, negligible).
    if pl.cdiv(rows, tile_r) * pl.cdiv(cols, tile_c) == 1:
        if tile_r >= 16:
            tile_r = ((tile_r // 2 + 7) // 8) * 8
        elif tile_c >= 256:
            tile_c = ((tile_c // 2 + 127) // 128) * 128

    n_row_tiles = pl.cdiv(rows, tile_r)
    n_col_tiles = pl.cdiv(cols, tile_c)

    # ---------- parameters (exp hoisted out of the hot loop) ----------------
    es_flat = jnp.exp(s.astype(jnp.float32)).astype(z.dtype).reshape(fold, cols)
    t_flat = t.astype(z.dtype).reshape(fold, cols)
    if fold == 1:
        p_rows = 1                             # broadcast over sublanes in-kernel
        es2, t2 = es_flat, t_flat
    else:
        # Tile params up to one row-tile so their block matches z's block
        # exactly (tile_r is always a multiple of fold; reps <= B < 8).
        p_rows = tile_r
        reps = tile_r // fold
        es2 = jnp.tile(es_flat, (reps, 1))
        t2 = jnp.tile(t_flat, (reps, 1))

    # ---------- pallas_call ---------------------------------------------------
    # Grid = (col tiles, row tiles): the row/batch axis is innermost so the
    # parameter blocks (whose index depends only on the column tile) stay
    # resident in VMEM across consecutive batch tiles.
    out2 = pl.pallas_call(
        _affine_flow_kernel,
        grid=(n_col_tiles, n_row_tiles),
        in_specs=[
            pl.BlockSpec((tile_r, tile_c), lambda jc, ir: (ir, jc)),
            pl.BlockSpec((p_rows, tile_c), lambda jc, ir: (0, jc)),
            pl.BlockSpec((p_rows, tile_c), lambda jc, ir: (0, jc)),
        ],
        out_specs=pl.BlockSpec((tile_r, tile_c), lambda jc, ir: (ir, jc)),
        out_shape=jax.ShapeDtypeStruct((rows, cols), z.dtype),
        compiler_params=pltpu.CompilerParams(
            dimension_semantics=("parallel", "parallel"),
            vmem_limit_bytes=int(vmem_limit),
        ),
    )(z2, es2, t2)

    z_out = out2[:rows_valid].reshape(z.shape)

    # log_det: same rule as the torch module -- indices of size-1 dims of s
    # (beyond the leading one) scale the sum by the matching z dims.
    # Scalar output, exactly like torch.sum(self.s).
    batch_dims = [i for i, d in enumerate(s.shape) if d == 1]
    if len(batch_dims) > 1:
        prod_batch_dims = int(np.prod([z.shape[i] for i in batch_dims[1:]]))
    else:
        prod_batch_dims = 1
    log_det = prod_batch_dims * jnp.sum(s.astype(jnp.float32))
    return z_out, log_det


if __name__ == "__main__":
    # Small shapes consistent with the module: shape=(C,H,W)=(4,16,16), batch=2.
    B, C, H, W = 2, 4, 16, 16
    key = jax.random.PRNGKey(0)
    kz, ks, kt = jax.random.split(key, 3)

    z = jax.random.normal(kz, (B, C, H, W), dtype=jnp.float32)
    # Module inits s, t to zeros; use deterministic small random values here so
    # the kernel math is actually exercised (synthetic params, not a checkpoint).
    s = 0.1 * jax.random.normal(ks, (1, C, H, W), dtype=jnp.float32)
    t = 0.1 * jax.random.normal(kt, (1, C, H, W), dtype=jnp.float32)

    z_out, log_det = affine_flow_forward(z, s, t)
    z_out = jax.block_until_ready(z_out)
    log_det = jax.block_until_ready(log_det)

    # Pure-JAX reference check.
    z_ref = z * jnp.exp(s) + t
    ld_ref = jnp.sum(s)
    assert jnp.allclose(z_out, z_ref, atol=1e-5, rtol=1e-5)
    assert jnp.allclose(log_det, ld_ref, atol=1e-4, rtol=1e-5)

    print("KERNEL_OK")
</pallas_src>

<mosaic_0001>
module attributes {stable_mosaic.version = 11 : i64} {
  func.func @_affine_flow_kernel(%arg0: i32, %arg1: i32, %arg2: memref<8x128xf32, #tpu.memory_space<vmem>>, %arg3: memref<8x128xf32, #tpu.memory_space<vmem>>, %arg4: memref<8x128xf32, #tpu.memory_space<vmem>>, %arg5: memref<8x128xf32, #tpu.memory_space<vmem>>) attributes {dimension_semantics = [#tpu.dimension_semantics<parallel>, #tpu.dimension_semantics<parallel>], iteration_bounds = array<i64: 1, 2>, scalar_prefetch = 0 : i64, scratch_operands = 0 : i64, tpu.core_type = #tpu.core_type<tc>, window_params = [{transform_indices = @transform_0, window_bounds = array<i64: 8, 128>}, {transform_indices = @transform_1, window_bounds = array<i64: 8, 128>}, {transform_indices = @transform_2, window_bounds = array<i64: 8, 128>}, {transform_indices = @transform_3, window_bounds = array<i64: 8, 128>}]} {
    %c0 = arith.constant 0 : index
    %c0_0 = arith.constant 0 : index
    %0 = vector.load %arg2[%c0, %c0_0] : memref<8x128xf32, #tpu.memory_space<vmem>>, vector<8x128xf32>
    %c0_1 = arith.constant 0 : index
    %c0_2 = arith.constant 0 : index
    %1 = vector.load %arg3[%c0_1, %c0_2] : memref<8x128xf32, #tpu.memory_space<vmem>>, vector<8x128xf32>
    %2 = arith.mulf %0, %1 : vector<8x128xf32>
    %c0_3 = arith.constant 0 : index
    %c0_4 = arith.constant 0 : index
    %3 = vector.load %arg4[%c0_3, %c0_4] : memref<8x128xf32, #tpu.memory_space<vmem>>, vector<8x128xf32>
    %4 = arith.addf %2, %3 : vector<8x128xf32>
    %c0_5 = arith.constant 0 : index
    %c0_6 = arith.constant 0 : index
    %5 = vector.load %arg5[%c0_5, %c0_6] : memref<8x128xf32, #tpu.memory_space<vmem>>, vector<8x128xf32>
    tpu.vector_store %arg5[%c0_5, %c0_6], %4 {strides = array<i32>} : memref<8x128xf32, #tpu.memory_space<vmem>>, vector<8x128xf32>,
    return
  }
  func.func @transform_0(%arg0: i32, %arg1: i32) -> (i32, i32) {
    %c0_i32 = arith.constant 0 : i32
    return %arg1, %arg0 : i32, i32
  }
  func.func @transform_1(%arg0: i32, %arg1: i32) -> (i32, i32) {
    %c0_i32 = arith.constant 0 : i32
    %c0_i32_0 = arith.constant 0 : i32
    return %c0_i32, %arg0 : i32, i32
  }
  func.func @transform_2(%arg0: i32, %arg1: i32) -> (i32, i32) {
    %c0_i32 = arith.constant 0 : i32
    %c0_i32_0 = arith.constant 0 : i32
    return %c0_i32, %arg0 : i32, i32
  }
  func.func @transform_3(%arg0: i32, %arg1: i32) -> (i32, i32) {
    %c0_i32 = arith.constant 0 : i32
    return %arg1, %arg0 : i32, i32
  }
}

</mosaic_0001>

<bundles_post_ra>
// kernel: tpu_custom_call.1
= control target key start
LH: loop header
LB: loop body
LE: loop exit
PB: predicated region body
PF: predicated region fallthrough
CT: control target
= control target key end

     0   :  { %8 = vsyncpa [#allocation3], 0  ;;  %s907_s0 = inlined_call_operand.hbm [shape: f32[16,128], index: 0, kind: input, shape index: {}]   ;;  %s908_s1 = inlined_call_operand.hbm [shape: f32[8,128], index: 1, kind: input, shape index: {}]   ;;  %s909_s2 = inlined_call_operand.hbm [shape: f32[8,128], index: 2, kind: input, shape index: {}]   ;;  %s910_s3 = inlined_call_operand.hbm [shape: f32[16,128], index: 3, kind: output, shape index: {}]  }
   0x1   :  { %10 = vsyncpa [#allocation3 + $0x1], 0 }
   0x2   :  { %11 = vsyncpa [#allocation6], 0 }
   0x3   :  { %12 = vsyncpa [#allocation4], 0 }
   0x4   :  { %14 = vsyncpa [#allocation4 + $0x1], 0  ;;  %s664_s12 = smov 0   ;;  %s666_s13 = smov 0  }
   0x5   :  { %s668_s14 = smov 0   ;;  %s670_s15 = smov 0  }
   0x6   :  { %s672_s16 = smov 0   ;;  %s674_s17 = smov 0  }
   0x7 LB: > { %s366_s18 = sadd.s32 4294967295, %s638_s17   ;;  %s367_s19 = sadd.s32 4294967294, %s638_s17   ;;  %s638_s17 = sphi %s674_s17, %s20_s17   ;;  %s634_s16 = sphi %s672_s16, %s933_s16   ;;  %s630_s15 = sphi %s670_s15, %s932_s15   ;;  %s626_s14 = sphi %s668_s14, %s931_s14   ;;  %s622_s13 = sphi %s666_s13, %s930_s13   ;;  %s618_s12 = sphi %s664_s12, %s929_s12  }
   0x8   : > { %p54_p0 = scmp.ne.s32.totalorder %s622_s13, %s618_s12  ;;  %p698_p1 = scmp.eq.s32.totalorder %s366_s18, 0 }
   0x9   : > { %p702_p2 = scmp.eq.s32.totalorder %s366_s18, 1  ;;  %p138_p3 = scmp.eq.s32.totalorder %s367_s19, 1 }
   0xa   : > { %s915_s20 = scalar_select %p698_p1, 1, 0 }
   0xb   : > { %s916_s21 = scalar_select %p702_p2, 1, 0 }
   0xc   : > { %p708_p4 = por %p698_p1, %p54_p0  ;;  %p368_p5 = scmp.ge.s32.totalorder %s638_s17, 1 }
   0xd   : > { %p713_p6 = por %p138_p3, %p54_p0  ;;  %p145_p7 = scmp.lt.s32.totalorder %s638_s17, 3 }
   0xe   : > { %s917_s22 = scalar_select %p708_p4, 1, 0 }
   0xf   : > { %s918_s23 = scalar_select %p713_p6, 1, 0 }
  0x10   : > { %p718_p8 = pnand %p368_p5, %p145_p7  ;;  %s640_s25 = smov [#allocation5]  }
  0x11   : > { %s160_s26 = sshll.u32 %s640_s25, 4  ;;  %s641_s27 = smov [#allocation7]   ;;  %s161_s26 = int_to_ptr.vmem [resolvable:$true] %s160_s26 }
  0x12   : > { %s919_s24 = scalar_select %p718_p8, 1, 0 }
  0x13   : > { %p395_p10 = pneg %p718_p8  ;;  %s173_s28 = sshll.u32 %s641_s27, 4  ;;  %s731_s28 = int_to_ptr.vmem [resolvable:$true] %s173_s28 }
  0x14   : > { %s466_s5 = scalar_lea.hbm %s908_s1, 128 }
  0x15   : > { %p727_p11 = pnand %p395_p10, %p698_p1  ;;  %p467_p12 = scmp.ne.s32.totalorder %s908_s1, %s466_s5 }
  0x16   : > { %p473_p5 = scmp.lt.u32.totalorder %s466_s5, %s908_s1 }
  0x17   : > { %p468_p13 = pneg %p727_p11 }
  0x19   : > { %p469_p0 = pnand %p468_p13, %p467_p12 }
  0x1b   : > { %p470_p3 = pneg %p469_p0 }
  0x1d   : > { %p475_p7 = pnand %p473_p5, %p470_p3 }
  0x1f   : > { %478 = shalt.err (!%p475_p7)
}
  0x20   : > { %s479_s10 = scalar_lea.vmem %s161_s26, 128  ;;  %p487_p1 = scmp.lt.s32.totalorder %s161_s26, %s161_s26 }
  0x21   : > { %p480_p10 = scmp.ne.s32.totalorder %s161_s26, %s479_s10  ;;  %p488_p4 = scmp.lt.s32.totalorder %s479_s10, %s479_s10 }
  0x23   : > { %p482_p9 = pnand %p480_p10, %p468_p13  ;;  %p489_p8 = por %p488_p4, %p487_p1 }
  0x25   : > { %p483_p6 = pneg %p482_p9 }
  0x27   : > { %p490_p2 = pnand %p489_p8, %p483_p6 }
  0x29   : > { %493 = shalt.err (!%p490_p2)
}
  0x2a   : > { %398 = dma.hbm_to_vmem [thread:$0]  (!%p727_p11), %s908_s1, 128, %s161_s26, [#allocation6]  }
  0x2b   : > { %s494_s27 = scalar_lea.hbm %s909_s2, 128 }
  0x2c   : > { %p495_p9 = scmp.ne.s32.totalorder %s909_s2, %s494_s27  ;;  %p501_p2 = scmp.lt.u32.totalorder %s494_s27, %s909_s2 }
  0x2e   : > { %p497_p1 = pnand %p495_p9, %p468_p13 }
  0x30   : > { %p498_p4 = pneg %p497_p1 }
  0x32   : > { %p503_p6 = pnand %p501_p2, %p498_p4 }
  0x34   : > { %506 = shalt.err (!%p503_p6)
}
  0x35   : > { %s507_s26 = scalar_lea.vmem %s731_s28, 128  ;;  %p515_p3 = scmp.lt.s32.totalorder %s731_s28, %s731_s28 }
  0x36   : > { %p508_p8 = scmp.ne.s32.totalorder %s731_s28, %s507_s26  ;;  %p516_p5 = scmp.lt.s32.totalorder %s507_s26, %s507_s26 }
  0x38   : > { %p510_p12 = pnand %p508_p8, %p468_p13  ;;  %p517_p7 = por %p516_p5, %p515_p3 }
  0x3a   : > { %p511_p0 = pneg %p510_p12 }
  0x3c   : > { %p518_p10 = pnand %p517_p7, %p511_p0 }
  0x3e   : > { %521 = shalt.err (!%p518_p10)
}
  0x3f   : > { %401 = dma.hbm_to_vmem [thread:$0]  (!%p727_p11), %s909_s2, 128, %s731_s28, [#allocation6]  }
  0x40   : > { %s29_s9 = sadd.s32 1, %s634_s16  ;;  %s41_s10 = sadd.s32 1, %s626_s14 }
  0x41   : > { %p30_p13 = scmp.ge.s32.totalorder %s29_s9, 2  ;;  %p48_p9 = scmp.ne.s32.totalorder %s626_s14, %s622_s13 }
  0x42   : > { %p49_p1 = scmp.eq.s32.totalorder %s638_s17, 0  ;;  %p412_p4 = scmp.lt.s32.totalorder %s638_s17, 2 }
  0x43   : > { %s935_s9 = smov (%p30_p13, %s29_s9), 0  ;;  %p921_p6 = scmp.ne.s32.totalorder %s916_s21, 0 }
  0x44   : > { %p50_p2 = por %p49_p1, %p48_p9  ;;  %s36_s11 = ssub.s32 %s634_s16, %s935_s9 }
  0x45   : > { %p790_p8 = por %p921_p6, %p48_p9  ;;  %s184_s18 = sand.u32 1, %s626_s14  }
  0x46   : > { %p39_p12 = scmp.eq.s32.totalorder %s36_s11, 0  ;;  %s372_s28 = sshll.u32 %s184_s18, 3 }
  0x47   : > { %s373_s19 = sshll.u32 %s634_s16, 7  ;;  %s188_s21 = scalar_lea.vmem [#allocation2], %s372_s28 }
  0x48   : > { %s799_s25 = scalar_select %p39_p12, %s626_s14, %s41_s10  }
  0x49   : > { %s804_s4 = scalar_lea.hbm %s907_s0, %s373_s19  ;;  %s196_s5 = sshll.u32 %s188_s21, 4  ;;  %s812_s5 = int_to_ptr.vmem [resolvable:$true] %s196_s5 }
  0x4a   : > { %p808_p11 = pnand %p412_p4, %p50_p2  ;;  %s185_s26 = scalar_lea.sflag [#allocation3], %s184_s18 }
  0x4b   : > { %s522_s7 = scalar_lea.hbm %s804_s4, 128  ;;  %s527_s11 = scalar_lea.hbm %s907_s0, 256 }
  0x4c   : > { %p523_p0 = scmp.ne.s32.totalorder %s804_s4, %s522_s7  ;;  %p524_p3 = pneg %p808_p11 }
  0x4d   : > { %p528_p10 = scmp.lt.u32.totalorder %s804_s4, %s907_s0  ;;  %p529_p13 = scmp.lt.u32.totalorder %s527_s11, %s522_s7 }
  0x4e   : > { %p525_p5 = pnand %p524_p3, %p523_p0  ;;  %p531_p1 = scmp.lt.u32.totalorder %s522_s7, %s804_s4 }
  0x4f   : > { %p530_p9 = por %p529_p13, %p528_p10 }
  0x50   : > { %p526_p7 = pneg %p525_p5 }
  0x51   : > { %p532_p4 = por %p531_p1, %p530_p9 }
  0x53   : > { %p533_p2 = pnand %p532_p4, %p526_p7 }
  0x55   : > { %536 = shalt.err (!%p533_p2)
}
  0x56   : > { %s537_s18 = scalar_lea.vmem %s812_s5, 128  ;;  %s642_s27 = smov [#allocation2]  }
  0x57   : > { %p538_p6 = scmp.ne.s32.totalorder %s812_s5, %s537_s18  ;;  %s542_s30 = sshll.u32 %s642_s27, 4  ;;  %s543_s30 = int_to_ptr.vmem [resolvable:$false] %s542_s30 }
  0x58   : > { %s544_s21 = scalar_lea.vmem %s543_s30, 256  ;;  %p545_p5 = scmp.lt.s32.totalorder %s812_s5, %s543_s30 }
  0x59   : > { %p540_p12 = pnand %p538_p6, %p524_p3  ;;  %p546_p10 = scmp.lt.s32.totalorder %s544_s21, %s537_s18 }
  0x5b   : > { %p541_p0 = pneg %p540_p12  ;;  %p547_p13 = por %p546_p10, %p545_p5 }
  0x5d   : > { %p548_p9 = pnand %p547_p13, %p541_p0 }
  0x5f   : > { %551 = shalt.err (!%p548_p9)
}
  0x60   : > { %405 = dma.hbm_to_vmem [thread:$0]  (!%p808_p11), %s804_s4, 128, %s812_s5, %s185_s26  }
  0x61   : > { %p924_p7 = scmp.ne.s32.totalorder %s919_s24, 0 }
  0x62   : > { %s842_s7 = sand.u32 (!%p924_p7), 1, %s622_s13   ;;  %p925_p3 = scmp.ne.s32.totalorder (!%p924_p7), %s917_s22, 0 }
  0x63   : > { %205 = sbr.rel (%p924_p7) target bundleno = 135 (0x87), region = 32  ;;  %s375_s8 = sshll.u32 (!%p924_p7), %s842_s7, 3 }
  0x64   : > { %s208_s10 = scalar_lea.sflag (!%p924_p7), [#allocation3], %s842_s7  ;;  %s211_s11 = scalar_lea.vmem (!%p924_p7), [#allocation2], %s375_s8 }
  0x6a   : > { %605 = dma.done.wait (%p925_p3), %s208_s10, 128  }
  0x6b   : > { %607 = vsyncadd (%p925_p3), %s208_s10, 4294967168  ;;  %p926_p1 = scmp.ne.s32.totalorder %s915_s20, 0 }
  0x6d   : > { %609 = dma.done.wait (%p926_p1), [#allocation6], 256  }
  0x6e   : > { %611 = vsyncadd (%p926_p1), [#allocation6], 4294967040  ;;  %v242_v0 = vld [vmem:[%s211_s11] sm:$0xff]  ;;  %v243_v1 = vld [vmem:[#allocation5] sm:$0xff]  ;;  %s241_s24 = scalar_lea.vmem [#allocation8], %s375_s8  ;;  %s380_s5 = sshll.u32 %s630_s15, 7 }
  0x6f   : > { %v245_v2 = vld [vmem:[#allocation7] sm:$0xff]  ;;  %s263_s4 = sshll.u32 %s241_s24, 4  ;;  %v244_v3 = vmul.f32 %v243_v1, %v242_v0  ;;  %s860_s20 = scalar_lea.hbm %s910_s3, %s380_s5  ;;  %s855_s4 = int_to_ptr.vmem [resolvable:$true] %s263_s4 }
  0x70   : > { %s249_s26 = scalar_lea.sflag [#allocation4], %s842_s7  ;;  %s552_s28 = scalar_lea.vmem %s855_s4, 128 }
  0x71   : > { %v246_v4 = vadd.f32 %v245_v2, %v244_v3  ;;  %p553_p11 = scmp.ne.s32.totalorder %s855_s4, %s552_s28  ;;  %s643_s15 = smov [#allocation8]  }
  0x72   : > { %s556_s19 = sshll.u32 %s643_s15, 4  ;;  %s557_s19 = int_to_ptr.vmem [resolvable:$false] %s556_s19 }
  0x73   : > { %247 = vst [vmem:[%s241_s24] sm:$0xff] %v246_v4  ;;  %p554_p4 = pnand %p553_p11, %p790_p8  ;;  %s558_s18 = scalar_lea.vmem %s557_s19, 256 }
  0x74   : > { %p559_p6 = scmp.lt.s32.totalorder %s855_s4, %s557_s19  ;;  %p560_p12 = scmp.lt.s32.totalorder %s558_s18, %s552_s28 }
  0x75   : > { %p555_p2 = pneg %p554_p4 }
  0x76   : > { %p561_p0 = por %p560_p12, %p559_p6 }
  0x78   : > { %p562_p5 = pnand %p561_p0, %p555_p2 }
  0x7a   : > { %565 = shalt.err (!%p562_p5)
}
  0x7b   : > { %s566_s27 = scalar_lea.hbm %s860_s20, 128  ;;  %s570_s7 = scalar_lea.hbm %s910_s3, 256 }
  0x7c   : > { %p567_p10 = scmp.ne.s32.totalorder %s860_s20, %s566_s27  ;;  %p571_p7 = scmp.lt.u32.totalorder %s860_s20, %s910_s3 }
  0x7d   : > { %p572_p3 = scmp.lt.u32.totalorder %s570_s7, %s566_s27  ;;  %p574_p11 = scmp.lt.u32.totalorder %s566_s27, %s860_s20 }
  0x7e   : > { %p568_p13 = pnand %p567_p10, %p790_p8 }
  0x7f   : > { %p573_p1 = por %p572_p3, %p571_p7 }
  0x80   : > { %p569_p9 = pneg %p568_p13 }
  0x81   : > { %p575_p4 = por %p574_p11, %p573_p1 }
  0x83   : > { %p576_p2 = pnand %p575_p4, %p569_p9 }
  0x85   : > { %579 = shalt.err (!%p576_p2)
}
  0x86   : > { %393 = dma.vmem_to_hbm [thread:$0]  (%p790_p8), %s855_s4, 128, %s860_s20, %s249_s26  }
  0x87 PF: > { %s275_s11 = sand.u32 1, %s618_s12   ;;  %p927_p6 = scmp.ne.s32.totalorder %s918_s23, 0 }
  0x88   : > { %p928_p12 = scmp.ge.s32.totalorder %s638_s17, 2  ;;  %s276_s24 = scalar_lea.sflag [#allocation4], %s275_s11 }
  0x8a   : > { %p407_p0 = pnand %p928_p12, %p927_p6 }
  0x8c   : > { %613 = dma.done.wait (!%p407_p0), %s276_s24, 128  }
  0x8d   : > { %615 = vsyncadd (!%p407_p0), %s276_s24, 4294967168  ;;  %s20_s17 = sadd.s32 1, %s638_s17   ;;  %s929_s12 = smov %s622_s13 }
  0x8e   : > { %p17_p5 = scmp.ge.s32.totalorder %s20_s17, 4   ;;  %s930_s13 = smov %s626_s14 }
  0x8f   : > { %s931_s14 = smov %s799_s25  ;;  %s932_s15 = smov %s634_s16 }
  0x90   : > { %s933_s16 = smov %s935_s9  ;;  %19 = sbr.rel (!%p17_p5) target bundleno = 7 (0x7), region = 87 }
  0x97   :  { %281 = vsyncpa [#allocation3], 1 }
  0x98   :  { %283 = vsyncpa [#allocation3 + $0x1], 1 }
  0x99   :  { %284 = vsyncpa [#allocation6], 1 }
  0x9a   :  { %285 = vsyncpa [#allocation4], 1 }
  0x9b   :  { %287 = vsyncpa [#allocation4 + $0x1], 1 }

</bundles_post_ra>
